<compile_context>
chip_gen: v7x
topology: tpu7x:2x2x1
jax: 0.10.0
libtpu: 0.0.40
codegen_flags: <defaults>
</compile_context>

<pallas_src>
import functools

import jax
import jax.numpy as jnp
from jax import lax
from jax.experimental import pallas as pl
from jax.experimental.pallas import tpu as pltpu


def _regressor_kernel(x_ref, w1_ref, w23_ref, vec_ref, o_ref):
    # x_ref  : [TILE_B, F] f32  -- natural row-major batch layout, streamed over grid
    # w1_ref : [H, F]      bf16 -- VMEM-resident (constant index_map)
    # w23_ref: [2, H, H]   bf16 -- w2 / w3 packed
    # vec_ref: [H, 8]      f32  -- cols: b1, b2, b3, w4 (as column), b4 (at [0, 4])
    # o_ref  : [1, TILE_B] f32  -- batch on lanes -> lane-dense store
    b1 = vec_ref[:, 0:1]
    b2 = vec_ref[:, 1:2]
    b3 = vec_ref[:, 2:3]
    w4c = vec_ref[:, 3:4]
    b4 = vec_ref[0:1, 4:5]

    x = x_ref[...].astype(jnp.bfloat16)            # in-kernel cast (VPU); x stays f32 in HBM

    # Layer 1: contract the feature axis of both operands -> [H, TILE_B]
    # (batch lands on lanes; the implicit transpose of x rides the XLU slot).
    h = lax.dot_general(w1_ref[...], x, (((1,), (1,)), ((), ())),
                        preferred_element_type=jnp.float32)
    h = jnp.maximum(h + b1, 0.0)
    # Layer 2: Linear + ReLU
    h = jnp.dot(w23_ref[0], h.astype(jnp.bfloat16), preferred_element_type=jnp.float32)
    h = jnp.maximum(h + b2, 0.0)
    # Layer 3: Linear + ReLU
    h = jnp.dot(w23_ref[1], h.astype(jnp.bfloat16), preferred_element_type=jnp.float32)
    h = jnp.maximum(h + b3, 0.0)
    # Layer 4: M=1, K=32 is the worst MXU shape -> VPU multiply + sublane reduce (XLU).
    out = jnp.sum(w4c * h, axis=0, keepdims=True) + b4          # [1, TILE_B] f32
    o_ref[...] = out.astype(o_ref.dtype)
    # GradientReversalLayer is identity in forward; Dropout is identity at inference.
    # TODO(synk): training-mode Dropout(p=0.2) (pltpu.prng_random_bits masking) not implemented.


@functools.partial(jax.jit, static_argnames=("tile_b",))
def regressor_forward(x, params, tile_b=2048):
    """x: [B, n_features] float32. params: PyTorch-layout weights [out, in], biases [out].

    tile_b guidance: ~1024 (v5e), 2048-4096 (v6e), 8192+ (v7x). Clamped to B for small batches.
    """
    B, F = x.shape
    H = params["w1"].shape[0]

    # Partial last blocks are fine (Pallas masks OOB output writes), so no batch padding
    # and no wrapper-side layout op on x at all.
    tile_eff = tile_b if B >= tile_b else B
    grid = (pl.cdiv(B, tile_eff),)

    # Resident operands, packed to cut per-step pipeline bookkeeping (9 -> 4 inputs).
    w1 = params["w1"].astype(jnp.bfloat16)                              # [H, F]
    w23 = jnp.stack([params["w2"], params["w3"]]).astype(jnp.bfloat16)  # [2, H, H]
    vec = jnp.zeros((H, 8), jnp.float32)
    vec = vec.at[:, 0].set(params["b1"].astype(jnp.float32))
    vec = vec.at[:, 1].set(params["b2"].astype(jnp.float32))
    vec = vec.at[:, 2].set(params["b3"].astype(jnp.float32))
    vec = vec.at[:, 3].set(params["w4"][0].astype(jnp.float32))         # w4 as a column
    vec = vec.at[0, 4].set(params["b4"][0].astype(jnp.float32))

    def resident(a):
        return pl.BlockSpec(a.shape, lambda i, nd=a.ndim: (0,) * nd)

    out = pl.pallas_call(
        _regressor_kernel,
        out_shape=jax.ShapeDtypeStruct((1, B), jnp.float32),
        grid=grid,
        in_specs=[
            pl.BlockSpec((tile_eff, F), lambda i: (i, 0)),   # x streamed over batch rows
            resident(w1), resident(w23), resident(vec),
        ],
        out_specs=pl.BlockSpec((1, tile_eff), lambda i: (0, i)),  # lane-dense output
        compiler_params=pltpu.CompilerParams(
            # Batch tiles are independent; on v7x switch to pltpu.CORE_PARALLEL if xprof
            # shows one TensorCore idle.
            dimension_semantics=("parallel",)),
    )(x, w1, w23, vec)

    return out.T   # [1, B] -> [B, 1] (pure reshape, no data movement)


def init_params(key, n_features, n_hidden=32):
    """Deterministic init mimicking nn.Linear's U(-1/sqrt(fan_in), 1/sqrt(fan_in)).
    Weights stored in PyTorch layout [out, in]; biases as [out]."""
    def linear(k, fan_in, fan_out):
        kw, kb = jax.random.split(k)
        bound = 1.0 / jnp.sqrt(fan_in)
        w = jax.random.uniform(kw, (fan_out, fan_in), jnp.float32, -bound, bound)
        b = jax.random.uniform(kb, (fan_out,), jnp.float32, -bound, bound)
        return w, b

    k1, k2, k3, k4 = jax.random.split(key, 4)
    w1, b1 = linear(k1, n_features, n_hidden)
    w2, b2 = linear(k2, n_hidden, n_hidden)
    w3, b3 = linear(k3, n_hidden, n_hidden)
    w4, b4 = linear(k4, n_hidden, 1)
    return dict(w1=w1, b1=b1, w2=w2, b2=b2, w3=w3, b3=b3, w4=w4, b4=b4)


def regressor_ref(x, p):
    """Pure-JAX reference mirroring the kernel's numerics exactly
    (bf16 matmul operands, f32 accumulation, f32 final layer)."""
    def hidden(h, w, b):
        y = jnp.dot(h.astype(jnp.bfloat16), w.astype(jnp.bfloat16).T,
                    preferred_element_type=jnp.float32) + b.astype(jnp.float32)
        return jnp.maximum(y, 0.0)
    h = hidden(x, p["w1"], p["b1"])
    h = hidden(h, p["w2"], p["b2"])
    h = hidden(h, p["w3"], p["b3"])
    return jnp.dot(h, p["w4"].astype(jnp.float32).T) + p["b4"].astype(jnp.float32)


if __name__ == "__main__":
    key = jax.random.PRNGKey(0)
    kx, kp = jax.random.split(key)

    batch, n_features, n_hidden = 8, 16, 32
    x = jax.random.normal(kx, (batch, n_features), jnp.float32)
    params = init_params(kp, n_features, n_hidden)

    y = regressor_forward(x, params)
    y = jax.block_until_ready(y)

    y_ref = regressor_ref(x, params)
    assert y.shape == (batch, 1), y.shape
    assert jnp.allclose(y, y_ref, atol=1e-4, rtol=1e-4), float(jnp.abs(y - y_ref).max())

    print("KERNEL_OK")
</pallas_src>

<mosaic_0001>
module attributes {stable_mosaic.version = 11 : i64} {
  func.func @_regressor_kernel(%arg0: i32, %arg1: memref<8x16xf32, #tpu.memory_space<vmem>>, %arg2: memref<32x16xbf16, #tpu.memory_space<vmem>>, %arg3: memref<2x32x32xbf16, #tpu.memory_space<vmem>>, %arg4: memref<32x8xf32, #tpu.memory_space<vmem>>, %arg5: memref<1x8xf32, #tpu.memory_space<vmem>>) attributes {dimension_semantics = [#tpu.dimension_semantics<parallel>], iteration_bounds = array<i64: 1>, scalar_prefetch = 0 : i64, scratch_operands = 0 : i64, tpu.core_type = #tpu.core_type<tc>, window_params = [{transform_indices = @transform_0, window_bounds = array<i64: 8, 16>}, {pipeline_mode = #tpu.pipeline_mode<synchronous>, transform_indices = @transform_1, window_bounds = array<i64: 32, 16>}, {pipeline_mode = #tpu.pipeline_mode<synchronous>, transform_indices = @transform_2, window_bounds = array<i64: 2, 32, 32>}, {pipeline_mode = #tpu.pipeline_mode<synchronous>, transform_indices = @transform_3, window_bounds = array<i64: 32, 8>}, {transform_indices = @transform_4, window_bounds = array<i64: 1, 8>}]} {
    %c0 = arith.constant 0 : index
    %c0_0 = arith.constant 0 : index
    %0 = vector.load %arg4[%c0, %c0_0] : memref<32x8xf32, #tpu.memory_space<vmem>>, vector<32x1xf32>
    %c0_1 = arith.constant 0 : index
    %c1 = arith.constant 1 : index
    %1 = vector.load %arg4[%c0_1, %c1] : memref<32x8xf32, #tpu.memory_space<vmem>>, vector<32x1xf32>
    %c0_2 = arith.constant 0 : index
    %c2 = arith.constant 2 : index
    %2 = vector.load %arg4[%c0_2, %c2] : memref<32x8xf32, #tpu.memory_space<vmem>>, vector<32x1xf32>
    %c0_3 = arith.constant 0 : index
    %c3 = arith.constant 3 : index
    %3 = vector.load %arg4[%c0_3, %c3] : memref<32x8xf32, #tpu.memory_space<vmem>>, vector<32x1xf32>
    %c0_4 = arith.constant 0 : index
    %c4 = arith.constant 4 : index
    %4 = vector.load %arg4[%c0_4, %c4] : memref<32x8xf32, #tpu.memory_space<vmem>>, vector<1x1xf32>
    %c0_5 = arith.constant 0 : index
    %c0_6 = arith.constant 0 : index
    %5 = vector.load %arg1[%c0_5, %c0_6] : memref<8x16xf32, #tpu.memory_space<vmem>>, vector<8x16xf32>
    %6 = arith.truncf %5 : vector<8x16xf32> to vector<8x16xbf16>
    %c0_7 = arith.constant 0 : index
    %c0_8 = arith.constant 0 : index
    %7 = vector.load %arg2[%c0_7, %c0_8] : memref<32x16xbf16, #tpu.memory_space<vmem>>, vector<32x16xbf16>
    %cst = arith.constant dense<0.000000e+00> : vector<32x8xf32>
    %8 = tpu.matmul %7, %6, %cst {dimension_numbers = #tpu.dot_dimension_numbers<[1], [1], [0], [0], [0, 0, 1, 0], [], []>} : vector<32x16xbf16>, vector<8x16xbf16>, vector<32x8xf32> -> vector<32x8xf32>
    %9 = vector.broadcast %0 : vector<32x1xf32> to vector<32x8xf32>
    %10 = arith.addf %8, %9 : vector<32x8xf32>
    %cst_9 = arith.constant 0.000000e+00 : f32
    %11 = vector.broadcast %cst_9 : f32 to vector<32x8xf32>
    %12 = arith.maximumf %10, %11 : vector<32x8xf32>
    %c0_10 = arith.constant 0 : index
    %c0_11 = arith.constant 0 : index
    %c0_12 = arith.constant 0 : index
    %13 = vector.load %arg3[%c0_10, %c0_11, %c0_12] : memref<2x32x32xbf16, #tpu.memory_space<vmem>>, vector<1x32x32xbf16>
    %14 = vector.shape_cast %13 : vector<1x32x32xbf16> to vector<32x32xbf16>
    %15 = arith.truncf %12 : vector<32x8xf32> to vector<32x8xbf16>
    %cst_13 = arith.constant dense<0.000000e+00> : vector<32x8xf32>
    %16 = tpu.matmul %14, %15, %cst_13 {dimension_numbers = #tpu.dot_dimension_numbers<[1], [0], [0], [1], [0, 0, 1, 1], [], []>} : vector<32x32xbf16>, vector<32x8xbf16>, vector<32x8xf32> -> vector<32x8xf32>
    %17 = vector.broadcast %1 : vector<32x1xf32> to vector<32x8xf32>
    %18 = arith.addf %16, %17 : vector<32x8xf32>
    %cst_14 = arith.constant 0.000000e+00 : f32
    %19 = vector.broadcast %cst_14 : f32 to vector<32x8xf32>
    %20 = arith.maximumf %18, %19 : vector<32x8xf32>
    %c1_15 = arith.constant 1 : index
    %c0_16 = arith.constant 0 : index
    %c0_17 = arith.constant 0 : index
    %21 = vector.load %arg3[%c1_15, %c0_16, %c0_17] : memref<2x32x32xbf16, #tpu.memory_space<vmem>>, vector<1x32x32xbf16>
    %22 = vector.shape_cast %21 : vector<1x32x32xbf16> to vector<32x32xbf16>
    %23 = arith.truncf %20 : vector<32x8xf32> to vector<32x8xbf16>
    %cst_18 = arith.constant dense<0.000000e+00> : vector<32x8xf32>
    %24 = tpu.matmul %22, %23, %cst_18 {dimension_numbers = #tpu.dot_dimension_numbers<[1], [0], [0], [1], [0, 0, 1, 1], [], []>} : vector<32x32xbf16>, vector<32x8xbf16>, vector<32x8xf32> -> vector<32x8xf32>
    %25 = vector.broadcast %2 : vector<32x1xf32> to vector<32x8xf32>
    %26 = arith.addf %24, %25 : vector<32x8xf32>
    %cst_19 = arith.constant 0.000000e+00 : f32
    %27 = vector.broadcast %cst_19 : f32 to vector<32x8xf32>
    %28 = arith.maximumf %26, %27 : vector<32x8xf32>
    %29 = vector.broadcast %3 : vector<32x1xf32> to vector<32x8xf32>
    %30 = arith.mulf %29, %28 : vector<32x8xf32>
    %cst_20 = arith.constant dense<0.000000e+00> : vector<8xf32>
    %31 = vector.multi_reduction <add>, %30, %cst_20 [0] : vector<32x8xf32> to vector<8xf32>
    %32 = vector.shape_cast %31 : vector<8xf32> to vector<1x8xf32>
    %33 = vector.broadcast %4 : vector<1x1xf32> to vector<1x8xf32>
    %34 = arith.addf %32, %33 : vector<1x8xf32>
    %c0_21 = arith.constant 0 : index
    %c0_22 = arith.constant 0 : index
    %35 = vector.load %arg5[%c0_21, %c0_22] : memref<1x8xf32, #tpu.memory_space<vmem>>, vector<1x8xf32>
    tpu.vector_store %arg5[%c0_21, %c0_22], %34 {strides = array<i32>} : memref<1x8xf32, #tpu.memory_space<vmem>>, vector<1x8xf32>,
    return
  }
  func.func @transform_0(%arg0: i32) -> (i32, i32) {
    %c0_i32 = arith.constant 0 : i32
    %c0_i32_0 = arith.constant 0 : i32
    return %arg0, %c0_i32 : i32, i32
  }
  func.func @transform_1(%arg0: i32) -> (i32, i32) {
    %c0_i32 = arith.constant 0 : i32
    %c0_i32_0 = arith.constant 0 : i32
    %c0_i32_1 = arith.constant 0 : i32
    return %c0_i32, %c0_i32_0 : i32, i32
  }
  func.func @transform_2(%arg0: i32) -> (i32, i32, i32) {
    %c0_i32 = arith.constant 0 : i32
    %c0_i32_0 = arith.constant 0 : i32
    %c0_i32_1 = arith.constant 0 : i32
    %c0_i32_2 = arith.constant 0 : i32
    return %c0_i32, %c0_i32_0, %c0_i32_1 : i32, i32, i32
  }
  func.func @transform_3(%arg0: i32) -> (i32, i32) {
    %c0_i32 = arith.constant 0 : i32
    %c0_i32_0 = arith.constant 0 : i32
    %c0_i32_1 = arith.constant 0 : i32
    return %c0_i32, %c0_i32_0 : i32, i32
  }
  func.func @transform_4(%arg0: i32) -> (i32, i32) {
    %c0_i32 = arith.constant 0 : i32
    %c0_i32_0 = arith.constant 0 : i32
    return %c0_i32, %arg0 : i32, i32
  }
}

</mosaic_0001>

<bundles_post_ra>
// kernel: regressor_forward.1
= control target key start
LH: loop header
LB: loop body
LE: loop exit
PB: predicated region body
PF: predicated region fallthrough
CT: control target
= control target key end

     0   :  { %vm60_vm0 = vcmask 130048   ;;  %v459_v3 = vmov 0   ;;  %s552_s0 = inlined_call_operand.vmem [shape: f32[8,16], index: 0, kind: input, shape index: {}]   ;;  %s553_s1 = inlined_call_operand.vmem [shape: bf16[32,16], index: 1, kind: input, shape index: {}]   ;;  %s554_s2 = inlined_call_operand.vmem [shape: bf16[2,32,32], index: 2, kind: input, shape index: {}]   ;;  %s555_s3 = inlined_call_operand.vmem [shape: f32[32,8], index: 3, kind: input, shape index: {}]   ;;  %s556_s4 = inlined_call_operand.hbm [shape: f32[1,8], index: 4, kind: output, shape index: {}]  }
   0x1   :  { %v24_v0 = vld [vmem:[%s552_s0] sm:$0xff]  ;;  %419 = vset.pattern.permute.xlu0 %v459_v3  ;;  %420 = vset.pattern.permute.xlu1 %v459_v3  ;;  %v502_v5 = vld [vmem:[%s555_s3 + $0x10] sm:$0xff]  ;;  %v20_v7 = vld [vmem:[%s555_s3 + $0x8] sm:$0xff] }
   0x2   :  { %v25_v1 = vpack.c.bf16 %v24_v0, %v24_v0  ;;  %v429_v2 = vld [vmem:[%s553_s1] sm:$0xff]   ;;  %42 = vperm.xlu1 %420, %v502_v5   ;;  %v22_v8 = vld [vmem:[%s555_s3 + $0x18] sm:$0xff] }
   0x3   :  { %v19_v4 = vld [vmem:[%s555_s3] sm:$0xff]  ;;  %392 = vmatprep.mubr.msk.bf16.mxu0 %vm60_vm0, %v429_v2 }
   0x4   :  { %412 = vmatprep.subr.msk.bf16.mxu0 %vm60_vm0, %v25_v1  ;;  %v68_v6 = vsel %vm60_vm0, %v25_v1, 0  ;;  %32 = vperm.xlu0 %419, %v19_v4  }
   0x5   :  { %391 = vmatpush3.bf16.xpose.msra.mxu0 %v68_v6 }
   0x6   :  { %9 = vsyncpa [#allocation3], 0  ;;  %v430_v9 = vld [vmem:[%s553_s1 + $0x8] sm:$0xff]   ;;  %47 = vperm.xlu1 %420, %v22_v8   ;;  %v431_v10 = vld [vmem:[%s554_s2] sm:$0xff]   ;;  %vm155_vm1 = vcmask 261120   ;;  %v460_v11 = vmov 1  }
   0x7   :  { %400 = vmatprep.mubr.msk.bf16.mxu1 %vm155_vm1, %v431_v10  ;;  %v432_v30 = vld [vmem:[%s554_s2 + $0x8] sm:$0xff]   ;;  %v433_v31 = vld [vmem:[%s554_s2 + $0x10] sm:$0xff]   ;;  %v461_v32 = vmov 2   ;;  %v462_v33 = vmov 3   ;;  %v463_v34 = vmov 4   ;;  %v434_v54 = vld [vmem:[%s554_s2 + $0x18] sm:$0xff]  }
   0x8   :  { %37 = vperm.xlu0 %419, %v20_v7   ;;  %v23_v35 = vld [vmem:[%s555_s3] sm:$0x1]  ;;  %vm327_vm2 = vcmask 64512   ;;  %s464_s2 = smov [#allocation2]   ;;  %vm347_vm3 = vcmask 57344  }
   0x9   :  { %s355_s10 = sshll.u32 %s464_s2, 4  ;;  %s356_s10 = int_to_ptr.vmem [resolvable:$true] %s355_s10 }
   0xa   :  { %422 = vset.pattern.permute.xlu1 %v460_v11  ;;  %s435_s11 = scalar_lea.vmem %s356_s10, 16  ;;  %s439_s12 = scalar_lea.vmem %s356_s10, 32 }
   0xb   :  { %134 = vperm.xlu1 %422, %v20_v7   ;;  %p436_p0 = scmp.ne.s32.totalorder %s356_s10, %s435_s11  ;;  %p440_p1 = scmp.lt.s32.totalorder %s356_s10, %s356_s10 }
   0xc   :  { %393 = vmatmul.mubr.msk.bf16.vlgmr.msra.gmra.mrb[0].mxu0 %vm60_vm0, %v430_v9  ;;  %421 = vset.pattern.permute.xlu0 %v460_v11  ;;  %p441_p2 = scmp.lt.s32.totalorder %s439_s12, %s435_s11 }
   0xd   :  { %130 = vperm.xlu0 %421, %v19_v4   ;;  %408 = vmatprep.mubr.msk.bf16.mxu0 %vm155_vm1, %v433_v31 }
   0xe   :  { %p442_p3 = por %p441_p2, %p440_p1 }
   0xf   :  { %138 = vperm.xlu1 %422, %v502_v5  }
  0x10   :  { %p443_p4 = pnand %p442_p3, %p436_p0 }
  0x11   :  { %142 = vperm.xlu0 %421, %v22_v8  }
  0x13   :  { %423 = vset.pattern.permute.xlu1 %v461_v32 }
  0x14   :  { %223 = vperm.xlu1 %423, %v19_v4  }
  0x15   :  { %424 = vset.pattern.permute.xlu0 %v461_v32 }
  0x16   :  { %227 = vperm.xlu0 %424, %v20_v7  }
  0x18   :  { %231 = vperm.xlu1 %423, %v502_v5  }
  0x1a   :  { %425 = vset.pattern.permute.xlu0 %v462_v33 }
  0x1b   :  { %308 = vperm.xlu0 %425, %v19_v4  }
  0x1c   :  { %235 = vperm.xlu1 %423, %v22_v8  }
  0x1f   :  { %320 = vperm.xlu0 %425, %v22_v8  }
  0x20   :  { %426 = vset.pattern.permute.xlu1 %v462_v33 }
  0x21   :  { %312 = vperm.xlu1 %426, %v20_v7  }
  0x23   :  { %428 = vset.pattern.permute.xlu0 %v463_v34 }
  0x25   :  { %316 = vperm.xlu1 %426, %v502_v5  }
  0x29   :  { %427 = vset.pattern.permute.xlu1 %v463_v34 }
  0x2a   :  { %343 = vperm.xlu1 %427, %v23_v35  }
  0x81   :  { %v43_v12 = vpop.permute.xlu1 %42 }
  0x83   :  { %v33_v13 = vpop.permute.xlu0 %32 }
  0x85   :  { %v48_v15 = vpop.permute.xlu1 %47 }
  0x87   :  { %v38_v20 = vpop.permute.xlu0 %37 }
  0x8a   :  { %v135_v36 = vpop.permute.xlu1 %134 }
  0x8c   :  { %v131_v37 = vpop.permute.xlu0 %130 }
  0x8e   :  { %v139_v38 = vpop.permute.xlu1 %138 }
  0x90   :  { %v143_v40 = vpop.permute.xlu0 %142 }
  0x93   :  { %v224_v55 = vpop.permute.xlu1 %223 }
  0x95   :  { %v228_v58 = vpop.permute.xlu0 %227 }
  0x97   :  { %v232_v56 = vpop.permute.xlu1 %231 }
  0x9a   :  { %v309_v63 = vpop.permute.xlu0 %308 }
  0x9b   :  { %v236_v57 = vpop.permute.xlu1 %235 }
  0x9e   :  { %v321_v11 = vpop.permute.xlu0 %320 }
  0xa0   :  { %v313_v59 = vpop.permute.xlu1 %312 }
  0xa4   :  { %v317_v7 = vpop.permute.xlu1 %316 }
  0xdf   :  { %v394_v14 = vpop.f32.mrb[0].mxu0 }
  0xe0   :  { %v113_v16 = vadd.f32 %v394_v14, %v43_v12  ;;  %v104_v17 = vpop.f32.mrb[1].mxu0 }
  0xe1   :  { %v105_v18 = vadd.f32 %v104_v17, %v33_v13  ;;  %v395_v19 = vpop.f32.mrb[2].mxu0 }
  0xe2   :  { %v116_v21 = vadd.f32 %v395_v19, %v48_v15  ;;  %v107_v22 = vpop.f32.mrb[3].mxu0  ;;  %v121_v24 = vmax.f32 %v113_v16, 0.0 }
  0xe3   :  { %v108_v23 = vadd.f32 %v107_v22, %v38_v20  ;;  %v119_v26 = vmax.f32 %v105_v18, 0.0 }
  0xe4   :  { %v122_v25 = vmax.f32 %v116_v21, 0.0 }
  0xe5   :  { %v120_v27 = vmax.f32 %v108_v23, 0.0 }
  0xe6   :  { %v128_v28 = vpack.c.bf16 %v122_v25, %v121_v24 }
  0xe7   :  { %v127_v29 = vpack.c.bf16 %v120_v27, %v119_v26  ;;  %v344_v27 = vpop.permute.xlu1 %343 }
  0xe9   :  { %396 = vmatprep.subr.bf16.mxu1 %v127_v29 }
  0xea   :  { %397 = vmatpush3.bf16.msra.mxu1 %v127_v29 }
  0xeb   :  { %398 = vmatprep.subr.bf16.mxu1 %v128_v28 }
  0xee   :  { %399 = vmatpush3.bf16.msra.mxu1 %v128_v28 }
  0xf1   :  { %401 = vmatmul.mubr.msk.bf16.vlgmr.msra.gmra.mrb[0].mxu1 %vm155_vm1, %v432_v30 }
 0x1c4   :  { %v402_v39 = vpop.f32.mrb[0].mxu1 }
 0x1c5   :  { %v205_v41 = vadd.f32 %v402_v39, %v139_v38  ;;  %v196_v42 = vpop.f32.mrb[1].mxu1 }
 0x1c6   :  { %v197_v43 = vadd.f32 %v196_v42, %v131_v37  ;;  %v403_v44 = vpop.f32.mrb[2].mxu1 }
 0x1c7   :  { %v208_v45 = vadd.f32 %v403_v44, %v143_v40  ;;  %v199_v46 = vpop.f32.mrb[3].mxu1  ;;  %v213_v48 = vmax.f32 %v205_v41, 0.0 }
 0x1c8   :  { %v200_v47 = vadd.f32 %v199_v46, %v135_v36  ;;  %v211_v50 = vmax.f32 %v197_v43, 0.0 }
 0x1c9   :  { %v214_v49 = vmax.f32 %v208_v45, 0.0 }
 0x1ca   :  { %v212_v51 = vmax.f32 %v200_v47, 0.0 }
 0x1cb   :  { %v221_v52 = vpack.c.bf16 %v214_v49, %v213_v48 }
 0x1cc   :  { %v220_v53 = vpack.c.bf16 %v212_v51, %v211_v50 }
 0x1ce   :  { %404 = vmatprep.subr.bf16.mxu0 %v220_v53 }
 0x1cf   :  { %405 = vmatpush3.bf16.msra.mxu0 %v220_v53 }
 0x1d0   :  { %406 = vmatprep.subr.bf16.mxu0 %v221_v52 }
 0x1d3   :  { %407 = vmatpush3.bf16.msra.mxu0 %v221_v52 }
 0x1d6   :  { %409 = vmatmul.mubr.msk.bf16.vlgmr.msra.gmra.mrb[4].mxu0 %vm155_vm1, %v434_v54 }
 0x2a9   :  { %v410_v60 = vpop.f32.mrb[4].mxu0 }
 0x2aa   :  { %v297_v61 = vadd.f32 %v410_v60, %v232_v56  ;;  %v288_v62 = vpop.f32.mrb[5].mxu0 }
 0x2ab   :  { %v289_v0 = vadd.f32 %v288_v62, %v224_v55  ;;  %v411_v1 = vpop.f32.mrb[6].mxu0 }
 0x2ac   :  { %v300_v2 = vadd.f32 %v411_v1, %v236_v57  ;;  %v291_v3 = vpop.f32.mrb[7].mxu0  ;;  %v305_v4 = vmax.f32 %v297_v61, 0.0 }
 0x2ad   :  { %v303_v5 = vmax.f32 %v289_v0, 0.0  ;;  %v292_v6 = vadd.f32 %v291_v3, %v228_v58 }
 0x2ae   :  { %v306_v8 = vmax.f32 %v300_v2, 0.0  ;;  %v325_v13 = vmul.f32 %v317_v7, %v305_v4 }
 0x2af   :  { %v323_v9 = vmul.f32 %v309_v63, %v303_v5  ;;  %v304_v10 = vmax.f32 %v292_v6, 0.0 }
 0x2b0   :  { %v326_v16 = vmul.f32 %v321_v11, %v306_v8  ;;  %v331_v18 = vsel %vm327_vm2, %v325_v13, 0.0 }
 0x2b1   :  { %v324_v12 = vmul.f32 %v313_v59, %v304_v10  ;;  %v328_v14 = vsel %vm327_vm2, %v323_v9, 0.0 }
 0x2b2   :  { %v333_v20 = vsel %vm327_vm2, %v326_v16, 0.0 }
 0x2b3   :  { %v329_v15 = vsel %vm327_vm2, %v324_v12, 0.0 }
 0x2b4   :  { %v330_v17 = vadd.f32 %v329_v15, %v328_v14 }
 0x2b6   :  { %v332_v19 = vadd.f32 %v331_v18, %v330_v17 }
 0x2b8   :  { %v334_v21 = vadd.f32 %v333_v20, %v332_v19 }
 0x2ba   :  { %v335_v22 = vrot.slane %v334_v21, 4 }
 0x2bc   :  { %v336_v23 = vadd.f32 %v335_v22, %v334_v21 }
 0x2be   :  { %v337_v24 = vrot.slane %v336_v23, 2 }
 0x2c0   :  { %v338_v25 = vadd.f32 %v337_v24, %v336_v23 }
 0x2c2   :  { %v339_v26 = vrot.slane %v338_v25, 1 }
 0x2c4   :  { %v340_v28 = vadd.f32 %v339_v26, %v338_v25 }
 0x2c6   :  { %v346_v29 = vadd.f32 %v344_v27, %v340_v28 }
 0x2c8   :  { %348 = vst.msk [vmem:[#allocation2] sm:$0x1] %vm347_vm3, %v346_v29 }
 0x2c9   :  { %446 = shalt.err (!%p443_p4)
}
 0x2ca   :  { %s447_s15 = scalar_lea.hbm %s556_s4, 16 }
 0x2cb   :  { %p448_p5 = scmp.ne.s32.totalorder %s556_s4, %s447_s15  ;;  %p451_p6 = scmp.lt.u32.totalorder %s447_s15, %s556_s4 }
 0x2cd   :  { %p453_p7 = pnand %p451_p6, %p448_p5 }
 0x2cf   :  { %456 = shalt.err (!%p453_p7)
}
 0x2d0   :  { %358 = dma.vmem_to_hbm [thread:$0]  %s356_s10, 16, %s556_s4, [#allocation3]  }
 0x2d1   :  { %457 = dma.done.wait [#allocation3], 16  }
 0x2d2   :  { %458 = vsyncadd [#allocation3], 4294967280 }
 0x2d3   :  { %362 = vsyncpa [#allocation3], 1 }

</bundles_post_ra>
